<compile_context>
chip_gen: v5e
topology: v5e:2x2
jax: 0.10.0
libtpu: 0.0.40
codegen_flags: <defaults>
</compile_context>

<pallas_src>
import jax
import jax.numpy as jnp
from jax.experimental import pallas as pl
from jax.experimental.pallas import tpu as pltpu


def _softplus(x):
    # Match torch.nn.Softplus (beta=1, threshold=20): linear for x > 20,
    # stable log1p(exp(x)) otherwise.
    safe = jnp.minimum(x, 20.0)
    return jnp.where(x > 20.0, x, jnp.log1p(jnp.exp(safe)))


def _decoder_kernel(x_ref, w1_ref, b1_ref, w2_ref, b2_ref, w3_ref, b3_ref, o_ref):
    # x_ref: (P, TM, C) block of the (N, P, M, C) features (batch dim squeezed).
    P = x_ref.shape[0]

    # Plane *sum* in f32 (unrolled static loop -> plain VPU adds); the mean's
    # 1/P is folded into the tiny layer-1 weight below, not into this
    # (TM, C) activation tile.
    x = x_ref[0].astype(jnp.float32)
    for p in range(1, P):
        x = x + x_ref[p].astype(jnp.float32)                          # (TM, C)

    # FC1 + Softplus  (weights are tiny; cast/scale once per grid step)
    w1 = w1_ref[...].astype(jnp.float32) * (1.0 / P)                  # (C, H)
    h = jnp.dot(x, w1, preferred_element_type=jnp.float32)
    h = _softplus(h + b1_ref[...].astype(jnp.float32))

    # FC2 + Softplus
    h = jnp.dot(h, w2_ref[...].astype(jnp.float32),
                preferred_element_type=jnp.float32)
    h = _softplus(h + b2_ref[...].astype(jnp.float32))

    # FC3 (linear)
    out = jnp.dot(h, w3_ref[...].astype(jnp.float32),
                  preferred_element_type=jnp.float32) + b3_ref[...].astype(jnp.float32)
    o_ref[...] = out.astype(o_ref.dtype)


def osg_decoder_single(sampled_features, params, *, tile_m=2048):
    """sampled_features: (N, P, M, C) float32 or bfloat16.  Returns (N, M, OUT) f32."""
    N, P, M, C = sampled_features.shape
    w1, b1, w2, b2, w3, b3 = params
    H = w1.shape[1]
    OUT = w3.shape[1]

    # Row tile along M.  Blocks sit directly on the (N, P, M, C) input, so no
    # XLA-side transpose/reshape/pad copies are required.  Keep the sublane
    # (second-to-last) block dim a multiple of 16 unless it covers all of M
    # (valid for both f32 and bf16 tiling); Pallas masks the ragged last block.
    tile_m = min(tile_m, M)
    if tile_m != M:
        tile_m = max(16, (tile_m // 16) * 16)
    grid = (N, pl.cdiv(M, tile_m))

    out = pl.pallas_call(
        _decoder_kernel,
        out_shape=jax.ShapeDtypeStruct((N, M, OUT), jnp.float32),
        grid_spec=pltpu.PrefetchScalarGridSpec(
            num_scalar_prefetch=0,
            grid=grid,
            in_specs=[
                # features: batch dim squeezed, full plane axis, row tile, full C
                pl.BlockSpec((None, P, tile_m, C), lambda n, m: (n, 0, m, 0)),
                pl.BlockSpec((C, H), lambda n, m: (0, 0)),    # w1
                pl.BlockSpec((1, H), lambda n, m: (0, 0)),    # b1
                pl.BlockSpec((H, H), lambda n, m: (0, 0)),    # w2
                pl.BlockSpec((1, H), lambda n, m: (0, 0)),    # b2
                pl.BlockSpec((H, OUT), lambda n, m: (0, 0)),  # w3
                pl.BlockSpec((1, OUT), lambda n, m: (0, 0)),  # b3
            ],
            out_specs=pl.BlockSpec((None, tile_m, OUT), lambda n, m: (n, m, 0)),
        ),
        compiler_params=pltpu.CompilerParams(
            dimension_semantics=("parallel", "parallel"),
            # Lane-padded feature block (C=16 -> 128 lanes) is ~8x its logical
            # size; budget explicitly so large tiles don't hit the 16/32 MiB
            # scoped defaults.  32 MiB is safe on v5e/v6e/v7x.
            vmem_limit_bytes=32 * 1024 * 1024,
        ),
    )(sampled_features, w1, b1, w2, b2, w3, b3)
    return out


def make_params(key, n_features, out_features, hidden_dim, dtype=jnp.float32):
    """Deterministic FullyConnectedLayer params with the runtime weight gain
    (1/sqrt(in_features)) folded into the stored weights."""
    k1, k2, k3 = jax.random.split(key, 3)

    def fc(k, fan_in, fan_out):
        # torch: weight ~ randn(out, in); runtime gain = 1/sqrt(in); bias = 0
        w = jax.random.normal(k, (fan_out, fan_in), jnp.float32)
        w = (w / jnp.sqrt(jnp.float32(fan_in))).T          # store as (in, out)
        b = jnp.zeros((1, fan_out), jnp.float32)
        return w.astype(dtype), b.astype(dtype)

    w1, b1 = fc(k1, n_features, hidden_dim)
    w2, b2 = fc(k2, hidden_dim, hidden_dim)
    w3, b3 = fc(k3, hidden_dim, out_features)
    return (w1, b1, w2, b2, w3, b3)


def _reference(sampled_features, params):
    """Plain-JAX reference (all math in f32, matching the kernel)."""
    w1, b1, w2, b2, w3, b3 = [p.astype(jnp.float32) for p in params]
    x = sampled_features.astype(jnp.float32).mean(axis=1)          # (N, M, C)
    N, M, C = x.shape
    x = x.reshape(N * M, C)
    h = _softplus(x @ w1 + b1)
    h = _softplus(h @ w2 + b2)
    out = h @ w3 + b3
    return out.reshape(N, M, -1)


if __name__ == "__main__":
    key = jax.random.PRNGKey(0)
    k_feat, k_par = jax.random.split(key)

    # small shapes: N=2 batch, P=3 triplanes, M=64 points, C=16 features
    N, P, M, C = 2, 3, 64, 16
    hidden_dim = 32
    out_features = 24

    feats_f32 = jax.random.normal(k_feat, (N, P, M, C), jnp.float32)
    params_f32 = make_params(k_par, C, out_features, hidden_dim)

    # f32 path
    out = jax.block_until_ready(osg_decoder_single(feats_f32, params_f32))
    ref = _reference(feats_f32, params_f32)
    assert out.shape == (N, M, out_features)
    assert jnp.allclose(out, ref, atol=1e-4, rtol=1e-4)

    # bf16-feature path (halves HBM read bytes; in-kernel math stays f32).
    feats_bf16 = feats_f32.astype(jnp.bfloat16)
    params_bf16 = tuple(p.astype(jnp.bfloat16) for p in params_f32)
    out_bf = jax.block_until_ready(osg_decoder_single(feats_bf16, params_bf16))
    ref_bf = _reference(feats_bf16, params_bf16)  # same rounded inputs, f32 math
    assert out_bf.shape == (N, M, out_features)
    assert jnp.allclose(out_bf, ref_bf, atol=1e-3, rtol=1e-3)

    print("KERNEL_OK")
</pallas_src>

<mosaic_0001>
module attributes {stable_mosaic.version = 11 : i64} {
  func.func @_decoder_kernel(%arg0: i32, %arg1: i32, %arg2: memref<1x3x64x16xf32, #tpu.memory_space<vmem>>, %arg3: memref<16x32xf32, #tpu.memory_space<vmem>>, %arg4: memref<1x32xf32, #tpu.memory_space<vmem>>, %arg5: memref<32x32xf32, #tpu.memory_space<vmem>>, %arg6: memref<1x32xf32, #tpu.memory_space<vmem>>, %arg7: memref<32x24xf32, #tpu.memory_space<vmem>>, %arg8: memref<1x24xf32, #tpu.memory_space<vmem>>, %arg9: memref<1x64x24xf32, #tpu.memory_space<vmem>>) attributes {dimension_semantics = [#tpu.dimension_semantics<parallel>, #tpu.dimension_semantics<parallel>], iteration_bounds = array<i64: 2, 1>, scalar_prefetch = 0 : i64, scratch_operands = 0 : i64, tpu.core_type = #tpu.core_type<tc>, window_params = [{transform_indices = @transform_0, window_bounds = array<i64: 1, 3, 64, 16>}, {pipeline_mode = #tpu.pipeline_mode<synchronous>, transform_indices = @transform_1, window_bounds = array<i64: 16, 32>}, {pipeline_mode = #tpu.pipeline_mode<synchronous>, transform_indices = @transform_2, window_bounds = array<i64: 1, 32>}, {pipeline_mode = #tpu.pipeline_mode<synchronous>, transform_indices = @transform_3, window_bounds = array<i64: 32, 32>}, {pipeline_mode = #tpu.pipeline_mode<synchronous>, transform_indices = @transform_4, window_bounds = array<i64: 1, 32>}, {pipeline_mode = #tpu.pipeline_mode<synchronous>, transform_indices = @transform_5, window_bounds = array<i64: 32, 24>}, {pipeline_mode = #tpu.pipeline_mode<synchronous>, transform_indices = @transform_6, window_bounds = array<i64: 1, 24>}, {transform_indices = @transform_7, window_bounds = array<i64: 1, 64, 24>}]} {
    %c0 = arith.constant 0 : index
    %c0_0 = arith.constant 0 : index
    %c0_1 = arith.constant 0 : index
    %c0_2 = arith.constant 0 : index
    %0 = vector.load %arg2[%c0, %c0_0, %c0_1, %c0_2] : memref<1x3x64x16xf32, #tpu.memory_space<vmem>>, vector<1x1x64x16xf32>
    %1 = vector.shape_cast %0 : vector<1x1x64x16xf32> to vector<64x16xf32>
    %c0_3 = arith.constant 0 : index
    %c1 = arith.constant 1 : index
    %c0_4 = arith.constant 0 : index
    %c0_5 = arith.constant 0 : index
    %2 = vector.load %arg2[%c0_3, %c1, %c0_4, %c0_5] : memref<1x3x64x16xf32, #tpu.memory_space<vmem>>, vector<1x1x64x16xf32>
    %3 = vector.shape_cast %2 : vector<1x1x64x16xf32> to vector<64x16xf32>
    %4 = arith.addf %1, %3 : vector<64x16xf32>
    %c0_6 = arith.constant 0 : index
    %c2 = arith.constant 2 : index
    %c0_7 = arith.constant 0 : index
    %c0_8 = arith.constant 0 : index
    %5 = vector.load %arg2[%c0_6, %c2, %c0_7, %c0_8] : memref<1x3x64x16xf32, #tpu.memory_space<vmem>>, vector<1x1x64x16xf32>
    %6 = vector.shape_cast %5 : vector<1x1x64x16xf32> to vector<64x16xf32>
    %7 = arith.addf %4, %6 : vector<64x16xf32>
    %c0_9 = arith.constant 0 : index
    %c0_10 = arith.constant 0 : index
    %8 = vector.load %arg3[%c0_9, %c0_10] : memref<16x32xf32, #tpu.memory_space<vmem>>, vector<16x32xf32>
    %cst = arith.constant 0.333333343 : f32
    %9 = vector.broadcast %cst : f32 to vector<16x32xf32>
    %10 = arith.mulf %8, %9 : vector<16x32xf32>
    %cst_11 = arith.constant dense<0.000000e+00> : vector<64x32xf32>
    %11 = tpu.matmul %7, %10, %cst_11 {dimension_numbers = #tpu.dot_dimension_numbers<[1], [0], [0], [1], [0, 0, 1, 1], [], []>} : vector<64x16xf32>, vector<16x32xf32>, vector<64x32xf32> -> vector<64x32xf32>
    %c0_12 = arith.constant 0 : index
    %c0_13 = arith.constant 0 : index
    %12 = vector.load %arg4[%c0_12, %c0_13] : memref<1x32xf32, #tpu.memory_space<vmem>>, vector<1x32xf32>
    %13 = vector.broadcast %12 : vector<1x32xf32> to vector<64x32xf32>
    %14 = arith.addf %11, %13 : vector<64x32xf32>
    %cst_14 = arith.constant 2.000000e+01 : f32
    %15 = vector.broadcast %cst_14 : f32 to vector<64x32xf32>
    %16 = arith.minimumf %14, %15 : vector<64x32xf32>
    %cst_15 = arith.constant 2.000000e+01 : f32
    %17 = vector.broadcast %cst_15 : f32 to vector<64x32xf32>
    %18 = arith.cmpf ogt, %14, %17 : vector<64x32xf32>
    %19 = math.exp %16 : vector<64x32xf32>
    %20 = math.log1p %19 : vector<64x32xf32>
    %21 = arith.select %18, %14, %20 : vector<64x32xi1>, vector<64x32xf32>
    %c0_16 = arith.constant 0 : index
    %c0_17 = arith.constant 0 : index
    %22 = vector.load %arg5[%c0_16, %c0_17] : memref<32x32xf32, #tpu.memory_space<vmem>>, vector<32x32xf32>
    %cst_18 = arith.constant dense<0.000000e+00> : vector<64x32xf32>
    %23 = tpu.matmul %21, %22, %cst_18 {dimension_numbers = #tpu.dot_dimension_numbers<[1], [0], [0], [1], [0, 0, 1, 1], [], []>} : vector<64x32xf32>, vector<32x32xf32>, vector<64x32xf32> -> vector<64x32xf32>
    %c0_19 = arith.constant 0 : index
    %c0_20 = arith.constant 0 : index
    %24 = vector.load %arg6[%c0_19, %c0_20] : memref<1x32xf32, #tpu.memory_space<vmem>>, vector<1x32xf32>
    %25 = vector.broadcast %24 : vector<1x32xf32> to vector<64x32xf32>
    %26 = arith.addf %23, %25 : vector<64x32xf32>
    %cst_21 = arith.constant 2.000000e+01 : f32
    %27 = vector.broadcast %cst_21 : f32 to vector<64x32xf32>
    %28 = arith.minimumf %26, %27 : vector<64x32xf32>
    %cst_22 = arith.constant 2.000000e+01 : f32
    %29 = vector.broadcast %cst_22 : f32 to vector<64x32xf32>
    %30 = arith.cmpf ogt, %26, %29 : vector<64x32xf32>
    %31 = math.exp %28 : vector<64x32xf32>
    %32 = math.log1p %31 : vector<64x32xf32>
    %33 = arith.select %30, %26, %32 : vector<64x32xi1>, vector<64x32xf32>
    %c0_23 = arith.constant 0 : index
    %c0_24 = arith.constant 0 : index
    %34 = vector.load %arg7[%c0_23, %c0_24] : memref<32x24xf32, #tpu.memory_space<vmem>>, vector<32x24xf32>
    %cst_25 = arith.constant dense<0.000000e+00> : vector<64x24xf32>
    %35 = tpu.matmul %33, %34, %cst_25 {dimension_numbers = #tpu.dot_dimension_numbers<[1], [0], [0], [1], [0, 0, 1, 1], [], []>} : vector<64x32xf32>, vector<32x24xf32>, vector<64x24xf32> -> vector<64x24xf32>
    %c0_26 = arith.constant 0 : index
    %c0_27 = arith.constant 0 : index
    %36 = vector.load %arg8[%c0_26, %c0_27] : memref<1x24xf32, #tpu.memory_space<vmem>>, vector<1x24xf32>
    %37 = vector.broadcast %36 : vector<1x24xf32> to vector<64x24xf32>
    %38 = arith.addf %35, %37 : vector<64x24xf32>
    %c0_28 = arith.constant 0 : index
    %c0_29 = arith.constant 0 : index
    %c0_30 = arith.constant 0 : index
    %39 = vector.load %arg9[%c0_28, %c0_29, %c0_30] : memref<1x64x24xf32, #tpu.memory_space<vmem>>, vector<1x64x24xf32>
    %40 = vector.shape_cast %39 : vector<1x64x24xf32> to vector<64x24xf32>
    %41 = vector.shape_cast %38 : vector<64x24xf32> to vector<1x64x24xf32>
    tpu.vector_store %arg9[%c0_28, %c0_29, %c0_30], %41 {strides = array<i32>} : memref<1x64x24xf32, #tpu.memory_space<vmem>>, vector<1x64x24xf32>,
    return
  }
  func.func @transform_0(%arg0: i32, %arg1: i32) -> (i32, i32, i32, i32) {
    %c0_i32 = arith.constant 0 : i32
    %c0_i32_0 = arith.constant 0 : i32
    %c0_i32_1 = arith.constant 0 : i32
    return %arg0, %c0_i32, %arg1, %c0_i32_0 : i32, i32, i32, i32
  }
  func.func @transform_1(%arg0: i32, %arg1: i32) -> (i32, i32) {
    %c0_i32 = arith.constant 0 : i32
    %c0_i32_0 = arith.constant 0 : i32
    %c0_i32_1 = arith.constant 0 : i32
    return %c0_i32, %c0_i32_0 : i32, i32
  }
  func.func @transform_2(%arg0: i32, %arg1: i32) -> (i32, i32) {
    %c0_i32 = arith.constant 0 : i32
    %c0_i32_0 = arith.constant 0 : i32
    %c0_i32_1 = arith.constant 0 : i32
    return %c0_i32, %c0_i32_0 : i32, i32
  }
  func.func @transform_3(%arg0: i32, %arg1: i32) -> (i32, i32) {
    %c0_i32 = arith.constant 0 : i32
    %c0_i32_0 = arith.constant 0 : i32
    %c0_i32_1 = arith.constant 0 : i32
    return %c0_i32, %c0_i32_0 : i32, i32
  }
  func.func @transform_4(%arg0: i32, %arg1: i32) -> (i32, i32) {
    %c0_i32 = arith.constant 0 : i32
    %c0_i32_0 = arith.constant 0 : i32
    %c0_i32_1 = arith.constant 0 : i32
    return %c0_i32, %c0_i32_0 : i32, i32
  }
  func.func @transform_5(%arg0: i32, %arg1: i32) -> (i32, i32) {
    %c0_i32 = arith.constant 0 : i32
    %c0_i32_0 = arith.constant 0 : i32
    %c0_i32_1 = arith.constant 0 : i32
    return %c0_i32, %c0_i32_0 : i32, i32
  }
  func.func @transform_6(%arg0: i32, %arg1: i32) -> (i32, i32) {
    %c0_i32 = arith.constant 0 : i32
    %c0_i32_0 = arith.constant 0 : i32
    %c0_i32_1 = arith.constant 0 : i32
    return %c0_i32, %c0_i32_0 : i32, i32
  }
  func.func @transform_7(%arg0: i32, %arg1: i32) -> (i32, i32, i32) {
    %c0_i32 = arith.constant 0 : i32
    %c0_i32_0 = arith.constant 0 : i32
    return %arg0, %arg1, %c0_i32 : i32, i32, i32
  }
}

</mosaic_0001>

<bundles_post_ra>
// kernel: tpu_custom_call.1
= control target key start
LH: loop header
LB: loop body
LE: loop exit
PB: predicated region body
PF: predicated region fallthrough
CT: control target
= control target key end

     0   :  { %s1118_s24 = smov 0   ;;  %s1120_s25 = smov 0   ;;  %s1287_s0 = inlined_call_operand.vmem [shape: f32[2,3,64,16], index: 0, kind: input, shape index: {}]   ;;  %s1288_s1 = inlined_call_operand.vmem [shape: f32[16,32], index: 1, kind: input, shape index: {}]   ;;  %s1289_s2 = inlined_call_operand.vmem [shape: f32[1,32], index: 2, kind: input, shape index: {}]   ;;  %s1290_s3 = inlined_call_operand.vmem [shape: f32[32,32], index: 3, kind: input, shape index: {}]   ;;  %s1291_s4 = inlined_call_operand.vmem [shape: f32[1,32], index: 4, kind: input, shape index: {}]   ;;  %s1292_s5 = inlined_call_operand.vmem [shape: f32[32,24], index: 5, kind: input, shape index: {}]   ;;  %s1293_s6 = inlined_call_operand.vmem [shape: f32[1,24], index: 6, kind: input, shape index: {}]   ;;  %s1294_s7 = inlined_call_operand.vmem [shape: f32[2,64,24], index: 7, kind: output, shape index: {}]  }
   0x1   :  { %s1122_s26 = smov 0  }
   0x2 LB: > { %s29_s27 = sadd.s32 1, %s1072_s25  ;;  %p905_p0 = scmp.ge.s32.totalorder %s1076_s26, 1  ;;  %s1076_s26 = sphi %s1122_s26, %s17_s26   ;;  %s1072_s25 = sphi %s1120_s25, %s1296_s25   ;;  %s1068_s24 = sphi %s1118_s24, %s1295_s24  }
   0x3   : > { %p31_p1 = scmp.ge.s32.totalorder %s29_s27, 2  ;;  %p258_p2 = scmp.lt.s32.totalorder %s1076_s26, 3 }
   0x5   : > { %s1298_s27 = smov (%p31_p1, %s29_s27), 0  ;;  %p259_p3 = pnand %p905_p0, %p258_p2 }
   0x6   : > { %p299_p4 = scmp.lt.s32.totalorder (!%p259_p3), %s1068_s24, 1 }
   0x7   : > { %262 = sbr.rel (%p259_p3) target bundleno = 523 (0x20b), region = 48 }
   0xc   : > { %v361_v0 = vld [vmem:[%s1288_s1 + $0x8] sm:$0xff]  ;;  %v360_v1 = vld [vmem:[%s1288_s1] sm:$0xff]  ;;  %s1300_s24 = smov (!%p299_p4, %s1068_s24), 1  ;;  %vm368_vm0 = vcmask 130048   ;;  %v549_v44 = vld [vmem:[%s1290_s3 + $0x18] sm:$0xff]  ;;  %vm554_vm2 = vcmask 261120  }
   0xd   : > { %v363_v2 = vmul.f32 0.33333334, %v361_v0  ;;  %v362_v3 = vmul.f32 0.33333334, %v360_v1  ;;  %s962_s9 = smul.u32 192, %s1300_s24  ;;  %591 = vmatpush.msra.mxu1 %v549_v44  ;;  %v548_v45 = vld [vmem:[%s1290_s3 + $0x10] sm:$0xff] }
   0xe   : > { %v547_v46 = vld [vmem:[%s1290_s3 + $0x8] sm:$0xff]  ;;  %v546_v47 = vld [vmem:[%s1290_s3] sm:$0xff]  ;;  %s951_s14 = sshll.u32 %s1300_s24, 6 }
   0xf   : > { %407 = vmatpush.msra.mxu0 %v363_v2  ;;  %952 = vmatpush.msra.mxu3 %v363_v2  ;;  %s1148_s12 = scalar_lea.vmem %s1287_s0, %s962_s9  ;;  %v1197_v48 = vld [vmem:[%s1289_s2] ss:$0 sm:$0xff]  ;;  %s316_s19 = scalar_lea.vmem %s1294_s7, %s951_s14 }
  0x10   : > { %v318_v4 = vld [vmem:[%s1148_s12] sm:$0xff]  ;;  %v319_v8 = vld [vmem:[%s1148_s12 + $0x8] sm:$0xff]  ;;  %v325_v11 = vld [vmem:[%s1148_s12 + $0x38] sm:$0xff]  ;;  %592 = vmatpush.msra.mxu1 %v548_v45 }
  0x11   : > { %408 = vmatpush.msra.mxu0 %v362_v3  ;;  %953 = vmatpush.msra.mxu3 %v362_v3  ;;  %v909_v5 = vld [vmem:[%s1148_s12 + $0x40] sm:$0xff]  ;;  %v910_v9 = vld [vmem:[%s1148_s12 + $0x48] sm:$0xff]  ;;  %v916_v12 = vld [vmem:[%s1148_s12 + $0x78] sm:$0xff] }
  0x12   : > { %v917_v6 = vld [vmem:[%s1148_s12 + $0x80] sm:$0xff]  ;;  %v335_v7 = vadd.f32 %v909_v5, %v318_v4  ;;  %v924_v13 = vld [vmem:[%s1148_s12 + $0xb8] sm:$0xff]  ;;  %v336_v14 = vadd.f32 %v910_v9, %v319_v8  ;;  %v342_v15 = vadd.f32 %v916_v12, %v325_v11  ;;  %v918_v16 = vld [vmem:[%s1148_s12 + $0x88] sm:$0xff]  ;;  %593 = vmatpush.msra.mxu1 %v547_v46 }
  0x13   : > { %v320_v19 = vld [vmem:[%s1148_s12 + $0x10] sm:$0xff]  ;;  %v321_v24 = vld [vmem:[%s1148_s12 + $0x18] sm:$0xff]  ;;  %v322_v29 = vld [vmem:[%s1148_s12 + $0x20] sm:$0xff]  ;;  %954 = vmatpush.msrb.mxu3 %v549_v44 }
  0x14   : > { %v352_v10 = vadd.f32 %v917_v6, %v335_v7  ;;  %v359_v17 = vadd.f32 %v924_v13, %v342_v15  ;;  %v353_v18 = vadd.f32 %v918_v16, %v336_v14  ;;  %v911_v20 = vld [vmem:[%s1148_s12 + $0x50] sm:$0xff]  ;;  %v912_v25 = vld [vmem:[%s1148_s12 + $0x58] sm:$0xff]  ;;  %v913_v30 = vld [vmem:[%s1148_s12 + $0x60] sm:$0xff]  ;;  %594 = vmatpush.msra.mxu1 %v546_v47 }
  0x15   : > { %v337_v21 = vadd.f32 %v911_v20, %v320_v19  ;;  %v919_v22 = vld [vmem:[%s1148_s12 + $0x90] sm:$0xff]  ;;  %v338_v26 = vadd.f32 %v912_v25, %v321_v24  ;;  %v920_v27 = vld [vmem:[%s1148_s12 + $0x98] sm:$0xff]  ;;  %v339_v31 = vadd.f32 %v913_v30, %v322_v29  ;;  %v921_v32 = vld [vmem:[%s1148_s12 + $0xa0] sm:$0xff]  ;;  %955 = vmatpush.msrb.mxu3 %v548_v45 }
  0x16   : > { %925 = vmatmul.msk.f32.vlgmr.msra.gmra.mxu0 %vm368_vm0, %v352_v10  ;;  %932 = vmatmul.msk.f32.vlgmr.msra.gmra.mxu3 %vm368_vm0, %v359_v17  ;;  %v323_v34 = vld [vmem:[%s1148_s12 + $0x28] sm:$0xff]  ;;  %v324_v39 = vld [vmem:[%s1148_s12 + $0x30] sm:$0xff] }
  0x17   : > { %v354_v23 = vadd.f32 %v919_v22, %v337_v21  ;;  %v355_v28 = vadd.f32 %v920_v27, %v338_v26  ;;  %v356_v33 = vadd.f32 %v921_v32, %v339_v31  ;;  %v914_v35 = vld [vmem:[%s1148_s12 + $0x68] sm:$0xff]  ;;  %v915_v40 = vld [vmem:[%s1148_s12 + $0x70] sm:$0xff]  ;;  %956 = vmatpush.msrb.mxu3 %v547_v46 }
  0x18   : > { %v340_v36 = vadd.f32 %v914_v35, %v323_v34  ;;  %v922_v37 = vld [vmem:[%s1148_s12 + $0xa8] sm:$0xff]  ;;  %v341_v41 = vadd.f32 %v915_v40, %v324_v39  ;;  %v923_v42 = vld [vmem:[%s1148_s12 + $0xb0] sm:$0xff] }
  0x19   : > { %957 = vmatpush.msrb.mxu3 %v546_v47 }
  0x1a   : > { %v357_v38 = vadd.f32 %v922_v37, %v340_v36  ;;  %v358_v43 = vadd.f32 %v923_v42, %v341_v41 }
  0x1e   : > { %926 = vmatmul.msk.f32.gmra.mxu0 %vm368_vm0, %v353_v18 }
  0x26   : > { %927 = vmatmul.msk.f32.gmra.mxu0 %vm368_vm0, %v354_v23 }
  0x2e   : > { %928 = vmatmul.msk.f32.gmra.mxu0 %vm368_vm0, %v355_v28 }
  0x36   : > { %929 = vmatmul.msk.f32.gmra.mxu0 %vm368_vm0, %v356_v33 }
  0x3e   : > { %930 = vmatmul.msk.f32.gmra.mxu0 %vm368_vm0, %v357_v38 }
  0x46   : > { %931 = vmatmul.msk.f32.gmra.mxu0 %vm368_vm0, %v358_v43 }
  0x93   : > { %v410_v49 = vpop.f32.mrf.mxu0 }
  0x94   : > { %v411_v50 = vadd.f32 %v1197_v48, %v410_v49 }
  0x96   : > { %v434_v51 = vmin.f32 %v411_v50, 20.0  ;;  %vm442_vm3 = vcmp.gt.f32.partialorder %v411_v50, 20.0 }
  0x98   : > { %v450_v52 = vmul.f32 1.442695, %v434_v51 }
  0x99   : > { %v431_v32 = vpop.f32.mrf.mxu3 }
  0x9a   : > { %990 = vpow2.f32 %v450_v52  ;;  %v1213_v38 = vadd.f32 %v1197_v48, %v431_v32 }
  0x9b   : > { %v413_v53 = vpop.f32.mrf.mxu0 }
  0x9c   : > { %v414_v54 = vadd.f32 %v1197_v48, %v413_v53  ;;  %v441_v46 = vmin.f32 %v1213_v38, 20.0 }
  0x9e   : > { %v435_v55 = vmin.f32 %v414_v54, 20.0  ;;  %vm443_vm5 = vcmp.gt.f32.partialorder %v414_v54, 20.0 }
  0xa0   : > { %v991_v56 = vpop.eup %990  ;;  %v452_v57 = vmul.f32 1.442695, %v435_v55  ;;  %v464_v55 = vmul.f32 1.442695, %v441_v46 }
  0xa1   : > { %v466_v58 = vadd.f32 1.0, %v991_v56  ;;  %v469_v59 = vmul.f32 -0.5, %v991_v56  ;;  %v472_v0 = vand.u32 2147483647, %v991_v56 }
  0xa2   : > { %992 = vpow2.f32 %v452_v57 }
  0xa3   : > { %v416_v60 = vpop.f32.mrf.mxu0  ;;  %994 = vlog2.f32 %v466_v58  ;;  %v470_v63 = vadd.f32 1.0, %v469_v59  ;;  %vm473_vm1 = vcmp.lt.f32.partialorder %v472_v0, 0.0004427343 }
  0xa4   : > { %v417_v61 = vadd.f32 %v1197_v48, %v416_v60 }
  0xa5   : > { %v471_v6 = vmul.f32 %v991_v56, %v470_v63 }
  0xa6   : > { %v436_v62 = vmin.f32 %v417_v61, 20.0  ;;  %vm444_vm7 = vcmp.gt.f32.partialorder %v417_v61, 20.0 }
  0xa8   : > { %v993_v1 = vpop.eup %992  ;;  %v454_v2 = vmul.f32 1.442695, %v436_v62 }
  0xa9   : > { %v995_v3 = vpop.eup %994  ;;  %v475_v4 = vadd.f32 1.0, %v993_v1  ;;  %v478_v7 = vmul.f32 -0.5, %v993_v1  ;;  %v481_v14 = vand.u32 2147483647, %v993_v1 }
  0xaa   : > { %996 = vpow2.f32 %v454_v2  ;;  %v468_v5 = vmul.f32 0.6931472, %v995_v3 }
  0xab   : > { %v419_v8 = vpop.f32.mrf.mxu0  ;;  %998 = vlog2.f32 %v475_v4  ;;  %v479_v13 = vadd.f32 1.0, %v478_v7  ;;  %vm482_vm4 = vcmp.lt.f32.partialorder %v481_v14, 0.0004427343 }
  0xac   : > { %v1203_v9 = vadd.f32 %v1197_v48, %v419_v8  ;;  %v474_v10 = vsel %vm473_vm1, %v471_v6, %v468_v5  ;;  %vm449_vm1 = vcmp.gt.f32.partialorder %v1213_v38, 20.0 }
  0xad   : > { %v538_v11 = vsel %vm442_vm3, %v411_v50, %v474_v10  ;;  %v480_v20 = vmul.f32 %v993_v1, %v479_v13 }
  0xae   : > { %v437_v12 = vmin.f32 %v1203_v9, 20.0  ;;  %933 = vmatmul.msk.f32.vlgmr.msra.gmra.mxu1 %vm554_vm2, %v538_v11  ;;  %vm445_vm9 = vcmp.gt.f32.partialorder %v1203_v9, 20.0 }
  0xb0   : > { %v997_v15 = vpop.eup %996  ;;  %v456_v16 = vmul.f32 1.442695, %v437_v12 }
  0xb1   : > { %v999_v17 = vpop.eup %998  ;;  %v484_v18 = vadd.f32 1.0, %v997_v15  ;;  %v487_v21 = vmul.f32 -0.5, %v997_v15  ;;  %v490_v28 = vand.u32 2147483647, %v997_v15 }
  0xb2   : > { %1000 = vpow2.f32 %v456_v16  ;;  %v477_v19 = vmul.f32 0.6931472, %v999_v17 }
  0xb3   : > { %v422_v22 = vpop.f32.mrf.mxu0  ;;  %1002 = vlog2.f32 %v484_v18  ;;  %v488_v27 = vadd.f32 1.0, %v487_v21  ;;  %vm491_vm6 = vcmp.lt.f32.partialorder %v490_v28, 0.0004427343 }
  0xb4   : > { %v1208_v23 = vadd.f32 %v1197_v48, %v422_v22  ;;  %v483_v24 = vsel %vm482_vm4, %v480_v20, %v477_v19 }
  0xb5   : > { %v539_v25 = vsel %vm443_vm5, %v414_v54, %v483_v24  ;;  %v489_v35 = vmul.f32 %v997_v15, %v488_v27 }
  0xb6   : > { %v438_v26 = vmin.f32 %v1208_v23, 20.0  ;;  %934 = vmatmul.msk.f32.gmra.mxu1 %vm554_vm2, %v539_v25  ;;  %vm446_vm11 = vcmp.gt.f32.partialorder %v1208_v23, 20.0 }
  0xb8   : > { %v1001_v29 = vpop.eup %1000  ;;  %v458_v30 = vmul.f32 1.442695, %v438_v26 }
  0xb9   : > { %v1003_v31 = vpop.eup %1002  ;;  %v493_v33 = vadd.f32 1.0, %v1001_v29  ;;  %v496_v36 = vmul.f32 -0.5, %v1001_v29  ;;  %v499_v44 = vand.u32 2147483647, %v1001_v29 }
  0xba   : > { %1004 = vpow2.f32 %v458_v30  ;;  %v486_v34 = vmul.f32 0.6931472, %v1003_v31 }
  0xbb   : > { %v425_v37 = vpop.f32.mrf.mxu0  ;;  %1006 = vlog2.f32 %v493_v33  ;;  %v497_v43 = vadd.f32 1.0, %v496_v36  ;;  %vm500_vm8 = vcmp.lt.f32.partialorder %v499_v44, 0.0004427343  ;;  %v735_v33 = vld [vmem:[%s1292_s5 + $0x18] sm:$0xff]  ;;  %v732_v36 = vld [vmem:[%s1292_s5] sm:$0xff] }
  0xbc   : > { %v426_v39 = vadd.f32 %v1197_v48, %v425_v37  ;;  %v492_v40 = vsel %vm491_vm6, %v489_v35, %v486_v34  ;;  %776 = vmatpush.msra.mxu2 %v735_v33  ;;  %958 = vmatpush.msra.mxu3 %v735_v33  ;;  %v734_v34 = vld [vmem:[%s1292_s5 + $0x10] sm:$0xff]  ;;  %v733_v35 = vld [vmem:[%s1292_s5 + $0x8] sm:$0xff]  ;;  %v1245_v37 = vld [vmem:[%s1291_s4] ss:$0 sm:$0xff] }
  0xbd   : > { %v540_v41 = vsel %vm444_vm7, %v417_v61, %v492_v40  ;;  %v498_v52 = vmul.f32 %v1001_v29, %v497_v43 }
  0xbe   : > { %v439_v42 = vmin.f32 %v426_v39, 20.0  ;;  %935 = vmatmul.msk.f32.gmra.mxu1 %vm554_vm2, %v540_v41  ;;  %vm447_vm13 = vcmp.gt.f32.partialorder %v426_v39, 20.0  ;;  %777 = vmatpush.msra.mxu2 %v734_v34 }
  0xbf   : > { %959 = vmatpush.msra.mxu3 %v734_v34 }
  0xc0   : > { %v1005_v45 = vpop.eup %1004  ;;  %v460_v47 = vmul.f32 1.442695, %v439_v42  ;;  %778 = vmatpush.msra.mxu2 %v733_v35 }
  0xc1   : > { %v1007_v49 = vpop.eup %1006  ;;  %v502_v50 = vadd.f32 1.0, %v1005_v45  ;;  %v505_v53 = vmul.f32 -0.5, %v1005_v45  ;;  %v508_v61 = vand.u32 2147483647, %v1005_v45  ;;  %960 = vmatpush.msra.mxu3 %v733_v35 }
  0xc2   : > { %1008 = vpow2.f32 %v460_v47  ;;  %v495_v51 = vmul.f32 0.6931472, %v1007_v49  ;;  %779 = vmatpush.msra.mxu2 %v732_v36 }
  0xc3   : > { %v428_v54 = vpop.f32.mrf.mxu0  ;;  %1010 = vlog2.f32 %v502_v50  ;;  %v506_v60 = vadd.f32 1.0, %v505_v53  ;;  %vm509_vm10 = vcmp.lt.f32.partialorder %v508_v61, 0.0004427343  ;;  %961 = vmatpush.msra.mxu3 %v732_v36 }
  0xc4   : > { %v429_v56 = vadd.f32 %v1197_v48, %v428_v54  ;;  %v501_v57 = vsel %vm500_vm8, %v498_v52, %v495_v51  ;;  %1012 = vpow2.f32 %v464_v55 }
  0xc5   : > { %v541_v58 = vsel %vm445_vm9, %v1203_v9, %v501_v57  ;;  %v507_v3 = vmul.f32 %v1005_v45, %v506_v60 }
  0xc6   : > { %v440_v59 = vmin.f32 %v429_v56, 20.0  ;;  %936 = vmatmul.msk.f32.gmra.mxu1 %vm554_vm2, %v541_v58  ;;  %vm448_vm15 = vcmp.gt.f32.partialorder %v429_v56, 20.0 }
  0xc8   : > { %v1009_v62 = vpop.eup %1008  ;;  %v462_v63 = vmul.f32 1.442695, %v440_v59 }
  0xc9   : > { %v1011_v0 = vpop.eup %1010  ;;  %v511_v1 = vadd.f32 1.0, %v1009_v62  ;;  %v514_v4 = vmul.f32 -0.5, %v1009_v62  ;;  %v517_v8 = vand.u32 2147483647, %v1009_v62 }
  0xca   : > { %1014 = vpow2.f32 %v462_v63  ;;  %v504_v2 = vmul.f32 0.6931472, %v1011_v0  ;;  %v1013_v6 = vpop.eup %1012 }
  0xcb   : > { %1016 = vlog2.f32 %v511_v1  ;;  %v515_v7 = vadd.f32 1.0, %v514_v4  ;;  %v529_v12 = vadd.f32 1.0, %v1013_v6  ;;  %vm518_vm12 = vcmp.lt.f32.partialorder %v517_v8, 0.0004427343 }
  0xcc   : > { %v510_v48 = vsel %vm509_vm10, %v507_v3, %v504_v2  ;;  %v532_v19 = vmul.f32 -0.5, %v1013_v6  ;;  %v535_v26 = vand.u32 2147483647, %v1013_v6 }
  0xcd   : > { %v542_v5 = vsel %vm446_vm11, %v1208_v23, %v510_v48  ;;  %v516_v14 = vmul.f32 %v1009_v62, %v515_v7 }
  0xce   : > { %937 = vmatmul.msk.f32.gmra.mxu1 %vm554_vm2, %v542_v5  ;;  %v533_v24 = vadd.f32 1.0, %v532_v19  ;;  %vm536_vm0 = vcmp.lt.f32.partialorder %v535_v26, 0.0004427343 }
  0xd0   : > { %v1015_v9 = vpop.eup %1014  ;;  %v534_v30 = vmul.f32 %v1013_v6, %v533_v24 }
  0xd1   : > { %v1017_v10 = vpop.eup %1016  ;;  %v520_v11 = vadd.f32 1.0, %v1015_v9  ;;  %v523_v15 = vmul.f32 -0.5, %v1015_v9  ;;  %v526_v20 = vand.u32 2147483647, %v1015_v9 }
  0xd2   : > { %v513_v13 = vmul.f32 0.6931472, %v1017_v10 }
  0xd3   : > { %1018 = vlog2.f32 %v520_v11  ;;  %v524_v18 = vadd.f32 1.0, %v523_v15  ;;  %vm527_vm14 = vcmp.lt.f32.partialorder %v526_v20, 0.0004427343 }
  0xd4   : > { %v519_v16 = vsel %vm518_vm12, %v516_v14, %v513_v13  ;;  %1020 = vlog2.f32 %v529_v12 }
  0xd5   : > { %v543_v17 = vsel %vm447_vm13, %v426_v39, %v519_v16  ;;  %v525_v23 = vmul.f32 %v1015_v9, %v524_v18 }
  0xd6   : > { %938 = vmatmul.msk.f32.gmra.mxu1 %vm554_vm2, %v543_v17 }
  0xd9   : > { %v1019_v21 = vpop.eup %1018 }
  0xda   : > { %v522_v22 = vmul.f32 0.6931472, %v1019_v21  ;;  %v1021_v25 = vpop.eup %1020 }
  0xdb   : > { %v531_v29 = vmul.f32 0.6931472, %v1021_v25 }
  0xdc   : > { %v528_v27 = vsel %vm527_vm14, %v525_v23, %v522_v22 }
  0xdd   : > { %v544_v28 = vsel %vm448_vm15, %v429_v56, %v528_v27  ;;  %v537_v31 = vsel %vm536_vm0, %v534_v30, %v531_v29 }
  0xde   : > { %939 = vmatmul.msk.f32.vlgmr.msrb.gmra.mxu3 %vm554_vm2, %v544_v28  ;;  %v545_v32 = vsel %vm449_vm1, %v1213_v38, %v537_v31 }
  0xe6   : > { %940 = vmatmul.msk.f32.gmra.mxu3 %vm554_vm2, %v545_v32 }
 0x12b   : > { %v596_v38 = vpop.f32.mrf.mxu1 }
 0x12c   : > { %v597_v39 = vadd.f32 %v1245_v37, %v596_v38 }
 0x12e   : > { %v620_v40 = vmin.f32 %v597_v39, 20.0  ;;  %vm628_vm4 = vcmp.gt.f32.partialorder %v597_v39, 20.0 }
 0x130   : > { %v636_v41 = vmul.f32 1.442695, %v620_v40 }
 0x132   : > { %1022 = vpow2.f32 %v636_v41 }
 0x133   : > { %v599_v42 = vpop.f32.mrf.mxu1 }
 0x134   : > { %v600_v43 = vadd.f32 %v1245_v37, %v599_v42 }
 0x136   : > { %v621_v44 = vmin.f32 %v600_v43, 20.0  ;;  %vm629_vm6 = vcmp.gt.f32.partialorder %v600_v43, 20.0 }
 0x138   : > { %v1023_v45 = vpop.eup %1022  ;;  %v638_v46 = vmul.f32 1.442695, %v621_v44 }
 0x139   : > { %v652_v47 = vadd.f32 1.0, %v1023_v45  ;;  %v655_v49 = vmul.f32 -0.5, %v1023_v45  ;;  %v658_v54 = vand.u32 2147483647, %v1023_v45 }
 0x13a   : > { %1024 = vpow2.f32 %v638_v46 }
 0x13b   : > { %v602_v50 = vpop.f32.mrf.mxu1  ;;  %1026 = vlog2.f32 %v652_v47  ;;  %v656_v53 = vadd.f32 1.0, %v655_v49  ;;  %vm659_vm3 = vcmp.lt.f32.partialorder %v658_v54, 0.0004427343 }
 0x13c   : > { %v603_v51 = vadd.f32 %v1245_v37, %v602_v50 }
 0x13d   : > { %v657_v60 = vmul.f32 %v1023_v45, %v656_v53 }
 0x13e   : > { %v622_v52 = vmin.f32 %v603_v51, 20.0  ;;  %vm630_vm8 = vcmp.gt.f32.partialorder %v603_v51, 20.0 }
 0x140   : > { %v1025_v55 = vpop.eup %1024  ;;  %v640_v56 = vmul.f32 1.442695, %v622_v52 }
 0x141   : > { %v1027_v57 = vpop.eup %1026  ;;  %v661_v58 = vadd.f32 1.0, %v1025_v55  ;;  %v664_v61 = vmul.f32 -0.5, %v1025_v55  ;;  %v667_v4 = vand.u32 2147483647, %v1025_v55 }
 0x142   : > { %1028 = vpow2.f32 %v640_v56  ;;  %v654_v59 = vmul.f32 0.6931472, %v1027_v57 }
 0x143   : > { %v605_v62 = vpop.f32.mrf.mxu1  ;;  %1030 = vlog2.f32 %v661_v58  ;;  %v665_v3 = vadd.f32 1.0, %v664_v61  ;;  %vm668_vm5 = vcmp.lt.f32.partialorder %v667_v4, 0.0004427343 }
 0x144   : > { %v606_v63 = vadd.f32 %v1245_v37, %v605_v62  ;;  %v660_v0 = vsel %vm659_vm3, %v657_v60, %v654_v59 }
 0x145   : > { %v724_v1 = vsel %vm628_vm4, %v597_v39, %v660_v0  ;;  %v666_v9 = vmul.f32 %v1025_v55, %v665_v3  ;;  %vm805_vm4 = vcmask 195584  }
 0x146   : > { %v623_v2 = vmin.f32 %v606_v63, 20.0  ;;  %941 = vmatmul.msk.f32.vlgmr.msra.gmra.mxu2 %vm554_vm2, %v724_v1  ;;  %vm631_vm10 = vcmp.gt.f32.partialorder %v606_v63, 20.0 }
 0x148   : > { %v1029_v48 = vpop.eup %1028  ;;  %v642_v5 = vmul.f32 1.442695, %v623_v2 }
 0x149   : > { %v1031_v6 = vpop.eup %1030  ;;  %v670_v7 = vadd.f32 1.0, %v1029_v48  ;;  %v673_v10 = vmul.f32 -0.5, %v1029_v48  ;;  %v676_v17 = vand.u32 2147483647, %v1029_v48 }
 0x14a   : > { %1032 = vpow2.f32 %v642_v5  ;;  %v663_v8 = vmul.f32 0.6931472, %v1031_v6 }
 0x14b   : > { %v608_v11 = vpop.f32.mrf.mxu1  ;;  %1034 = vlog2.f32 %v670_v7  ;;  %v674_v16 = vadd.f32 1.0, %v673_v10  ;;  %vm677_vm7 = vcmp.lt.f32.partialorder %v676_v17, 0.0004427343 }
 0x14c   : > { %v609_v12 = vadd.f32 %v1245_v37, %v608_v11  ;;  %v669_v13 = vsel %vm668_vm5, %v666_v9, %v663_v8 }
 0x14d   : > { %v725_v14 = vsel %vm629_vm6, %v600_v43, %v669_v13  ;;  %v675_v23 = vmul.f32 %v1029_v48, %v674_v16 }
 0x14e   : > { %v624_v15 = vmin.f32 %v609_v12, 20.0  ;;  %942 = vmatmul.msk.f32.gmra.mxu2 %vm554_vm2, %v725_v14  ;;  %vm632_vm12 = vcmp.gt.f32.partialorder %v609_v12, 20.0 }
 0x150   : > { %v1033_v18 = vpop.eup %1032  ;;  %v644_v19 = vmul.f32 1.442695, %v624_v15 }
 0x151   : > { %v1035_v20 = vpop.eup %1034  ;;  %v679_v21 = vadd.f32 1.0, %v1033_v18  ;;  %v682_v24 = vmul.f32 -0.5, %v1033_v18  ;;  %v685_v31 = vand.u32 2147483647, %v1033_v18 }
 0x152   : > { %1036 = vpow2.f32 %v644_v19  ;;  %v672_v22 = vmul.f32 0.6931472, %v1035_v20 }
 0x153   : > { %v611_v25 = vpop.f32.mrf.mxu1  ;;  %1038 = vlog2.f32 %v679_v21  ;;  %v683_v30 = vadd.f32 1.0, %v682_v24  ;;  %vm686_vm9 = vcmp.lt.f32.partialorder %v685_v31, 0.0004427343 }
 0x154   : > { %v612_v26 = vadd.f32 %v1245_v37, %v611_v25  ;;  %v678_v27 = vsel %vm677_vm7, %v675_v23, %v672_v22  ;;  %v989_v22 = vld [vmem:[%s1293_s6] ss:$0 sm:$0xff] }
 0x155   : > { %v726_v28 = vsel %vm630_vm8, %v603_v51, %v678_v27  ;;  %v684_v38 = vmul.f32 %v1033_v18, %v683_v30 }
 0x156   : > { %v625_v29 = vmin.f32 %v612_v26, 20.0  ;;  %943 = vmatmul.msk.f32.gmra.mxu2 %vm554_vm2, %v726_v28  ;;  %vm633_vm14 = vcmp.gt.f32.partialorder %v612_v26, 20.0 }
 0x158   : > { %v1037_v32 = vpop.eup %1036  ;;  %v646_v33 = vmul.f32 1.442695, %v625_v29 }
 0x159   : > { %v1039_v34 = vpop.eup %1038  ;;  %v688_v35 = vadd.f32 1.0, %v1037_v32  ;;  %v691_v39 = vmul.f32 -0.5, %v1037_v32  ;;  %v694_v43 = vand.u32 2147483647, %v1037_v32 }
 0x15a   : > { %1040 = vpow2.f32 %v646_v33  ;;  %v681_v36 = vmul.f32 0.6931472, %v1039_v34 }
 0x15b   : > { %1042 = vlog2.f32 %v688_v35  ;;  %v692_v42 = vadd.f32 1.0, %v691_v39  ;;  %vm695_vm11 = vcmp.lt.f32.partialorder %v694_v43, 0.0004427343 }
 0x15c   : > { %v687_v40 = vsel %vm686_vm9, %v684_v38, %v681_v36 }
 0x15d   : > { %v727_v41 = vsel %vm631_vm10, %v606_v63, %v687_v40  ;;  %v693_v51 = vmul.f32 %v1037_v32, %v692_v42 }
 0x15e   : > { %944 = vmatmul.msk.f32.gmra.mxu2 %vm554_vm2, %v727_v41 }
 0x160   : > { %v1041_v44 = vpop.eup %1040 }
 0x161   : > { %v1043_v45 = vpop.eup %1042  ;;  %v614_v46 = vpop.f32.mrf.mxu3  ;;  %v697_v47 = vadd.f32 1.0, %v1041_v44  ;;  %v700_v52 = vmul.f32 -0.5, %v1041_v44  ;;  %v703_v58 = vand.u32 2147483647, %v1041_v44 }
 0x162   : > { %v615_v49 = vadd.f32 %v1245_v37, %v614_v46  ;;  %v690_v50 = vmul.f32 0.6931472, %v1043_v45 }
 0x163   : > { %1044 = vlog2.f32 %v697_v47  ;;  %v701_v57 = vadd.f32 1.0, %v700_v52  ;;  %vm704_vm13 = vcmp.lt.f32.partialorder %v703_v58, 0.0004427343 }
 0x164   : > { %v626_v53 = vmin.f32 %v615_v49, 20.0  ;;  %v696_v54 = vsel %vm695_vm11, %v693_v51, %v690_v50  ;;  %vm634_vm0 = vcmp.gt.f32.partialorder %v615_v49, 20.0 }
 0x165   : > { %v728_v55 = vsel %vm632_vm12, %v609_v12, %v696_v54  ;;  %v702_v63 = vmul.f32 %v1041_v44, %v701_v57 }
 0x166   : > { %v648_v56 = vmul.f32 1.442695, %v626_v53  ;;  %945 = vmatmul.msk.f32.gmra.mxu2 %vm554_vm2, %v728_v55 }
 0x168   : > { %1046 = vpow2.f32 %v648_v56 }
 0x169   : > { %v1045_v59 = vpop.eup %1044  ;;  %v617_v60 = vpop.f32.mrf.mxu3 }
 0x16a   : > { %v618_v61 = vadd.f32 %v1245_v37, %v617_v60  ;;  %v699_v62 = vmul.f32 0.6931472, %v1045_v59 }
 0x16c   : > { %v627_v0 = vmin.f32 %v618_v61, 20.0  ;;  %v705_v1 = vsel %vm704_vm13, %v702_v63, %v699_v62  ;;  %vm635_vm3 = vcmp.gt.f32.partialorder %v618_v61, 20.0 }
 0x16d   : > { %v729_v2 = vsel %vm633_vm14, %v612_v26, %v705_v1 }
 0x16e   : > { %v1047_v3 = vpop.eup %1046  ;;  %v650_v4 = vmul.f32 1.442695, %v627_v0  ;;  %946 = vmatmul.msk.f32.gmra.mxu2 %vm554_vm2, %v729_v2 }
 0x16f   : > { %v706_v48 = vadd.f32 1.0, %v1047_v3  ;;  %v709_v5 = vmul.f32 -0.5, %v1047_v3  ;;  %v712_v7 = vand.u32 2147483647, %v1047_v3 }
 0x170   : > { %1048 = vpow2.f32 %v650_v4 }
 0x171   : > { %1050 = vlog2.f32 %v706_v48  ;;  %v710_v6 = vadd.f32 1.0, %v709_v5  ;;  %vm713_vm15 = vcmp.lt.f32.partialorder %v712_v7, 0.0004427343 }
 0x173   : > { %v711_v11 = vmul.f32 %v1047_v3, %v710_v6 }
 0x176   : > { %v1049_v8 = vpop.eup %1048 }
 0x177   : > { %v1051_v9 = vpop.eup %1050  ;;  %v715_v37 = vadd.f32 1.0, %v1049_v8  ;;  %v718_v12 = vmul.f32 -0.5, %v1049_v8  ;;  %v721_v16 = vand.u32 2147483647, %v1049_v8 }
 0x178   : > { %v708_v10 = vmul.f32 0.6931472, %v1051_v9 }
 0x179   : > { %1052 = vlog2.f32 %v715_v37  ;;  %v719_v15 = vadd.f32 1.0, %v718_v12  ;;  %vm722_vm1 = vcmp.lt.f32.partialorder %v721_v16, 0.0004427343 }
 0x17a   : > { %v714_v13 = vsel %vm713_vm15, %v711_v11, %v708_v10 }
 0x17b   : > { %v730_v14 = vsel %vm634_vm0, %v615_v49, %v714_v13  ;;  %v720_v19 = vmul.f32 %v1049_v8, %v719_v15 }
 0x17c   : > { %947 = vmatmul.msk.f32.vlgmr.msra.gmra.mxu3 %vm554_vm2, %v730_v14 }
 0x17f   : > { %v1053_v17 = vpop.eup %1052 }
 0x180   : > { %v717_v18 = vmul.f32 0.6931472, %v1053_v17 }
 0x182   : > { %v723_v20 = vsel %vm722_vm1, %v720_v19, %v717_v18 }
 0x183   : > { %v731_v21 = vsel %vm635_vm3, %v618_v61, %v723_v20 }
 0x184   : > { %948 = vmatmul.msk.f32.gmra.mxu3 %vm554_vm2, %v731_v21 }
 0x1c9   : > { %v781_v23 = vpop.f32.mrf.mxu2 }
 0x1ca   : > { %v782_v24 = vadd.f32 %v989_v22, %v781_v23 }
 0x1cc   : > { %806 = vst.msk [vmem:[%s316_s19] sm:$0xff] %vm805_vm4, %v782_v24 }
 0x1d1   : > { %v784_v25 = vpop.f32.mrf.mxu2 }
 0x1d2   : > { %v785_v26 = vadd.f32 %v989_v22, %v784_v25 }
 0x1d4   : > { %807 = vst.msk [vmem:[%s316_s19 + $0x8] sm:$0xff] %vm805_vm4, %v785_v26 }
 0x1d9   : > { %v787_v27 = vpop.f32.mrf.mxu2 }
 0x1da   : > { %v788_v28 = vadd.f32 %v989_v22, %v787_v27 }
 0x1dc   : > { %808 = vst.msk [vmem:[%s316_s19 + $0x10] sm:$0xff] %vm805_vm4, %v788_v28 }
 0x1e1   : > { %v790_v29 = vpop.f32.mrf.mxu2 }
 0x1e2   : > { %v791_v30 = vadd.f32 %v989_v22, %v790_v29 }
 0x1e4   : > { %809 = vst.msk [vmem:[%s316_s19 + $0x18] sm:$0xff] %vm805_vm4, %v791_v30 }
 0x1e9   : > { %v793_v31 = vpop.f32.mrf.mxu2 }
 0x1ea   : > { %v794_v32 = vadd.f32 %v989_v22, %v793_v31 }
 0x1ec   : > { %810 = vst.msk [vmem:[%s316_s19 + $0x20] sm:$0xff] %vm805_vm4, %v794_v32 }
 0x1f1   : > { %v796_v33 = vpop.f32.mrf.mxu2 }
 0x1f2   : > { %v797_v34 = vadd.f32 %v989_v22, %v796_v33 }
 0x1f4   : > { %811 = vst.msk [vmem:[%s316_s19 + $0x28] sm:$0xff] %vm805_vm4, %v797_v34 }
 0x1ff   : > { %v799_v35 = vpop.f32.mrf.mxu3 }
 0x200   : > { %v800_v36 = vadd.f32 %v989_v22, %v799_v35 }
 0x202   : > { %812 = vst.msk [vmem:[%s316_s19 + $0x30] sm:$0xff] %vm805_vm4, %v800_v36 }
 0x207   : > { %v802_v38 = vpop.f32.mrf.mxu3 }
 0x208   : > { %v803_v39 = vadd.f32 %v989_v22, %v802_v38 }
 0x20a   : > { %813 = vst.msk [vmem:[%s316_s19 + $0x38] sm:$0xff] %vm805_vm4, %v803_v39 }
 0x20b PF: > { %s17_s26 = sadd.s32 1, %s1076_s26   ;;  %s1295_s24 = smov %s1072_s25 }
 0x20c   : > { %p14_p5 = scmp.ge.s32.totalorder %s17_s26, 4   ;;  %s1296_s25 = smov %s1298_s27 }
 0x20e   :  { %16 = sbr.rel (!%p14_p5) target bundleno = 2 (0x2), region = 80 }

</bundles_post_ra>
